<compile_context>
chip_gen: v6e
topology: v6e:2x2x1
jax: 0.10.0
libtpu: 0.0.40
codegen_flags: <defaults>
</compile_context>

<pallas_src>
import functools

import jax
import jax.numpy as jnp
from jax import lax
from jax.experimental import pallas as pl
from jax.experimental.pallas import tpu as pltpu

_LANES = 128
_VMEM = pl.BlockSpec(memory_space=pltpu.MemorySpace.VMEM)


# ----------------------------- kernel ----------------------------------------

def _fused_decoder_kernel(z_ref, ei_ref, wpack_ref, rec_a_ref, feats_ref):
    """Fused InnerProductDecoder + FeatureDecoder (eval mode).

    z_ref     : (N, D)           f32  node embeddings
    ei_ref    : (2, E_pad)       i32  row 0 = src ids, row 1 = dst ids (zero-padded lanes)
    wpack_ref : (D + L + 2, L)   f32  rows [0:D]   = W1 (lane-padded, zero-filled)
                                      rows [D:D+L] = W2 (row+lane padded, zero-filled)
                                      row  [D+L]   = b1, row [D+L+1] = b2
    rec_a_ref : (8, E_pad)       f32  sigmoid(<z[src], z[dst]>) in every sublane row
    feats_ref : (N, L)           f32  sigmoid(relu(z@W1+b1) @ W2 + b2), lane-padded
    """
    n, d = z_ref.shape
    l = wpack_ref.shape[1]
    e_pad = ei_ref.shape[1]

    z = z_ref[...].astype(jnp.float32)                          # (N, D)

    # -------- InnerProductDecoder: E on the lane axis throughout ------------
    ids = ei_ref[...]                                           # (2, E_pad) i32
    node_iota = lax.broadcasted_iota(jnp.int32, (n, e_pad), 0)  # (N, E_pad)
    sel_src = (node_iota == ids[0:1, :]).astype(jnp.float32)    # (N, E_pad)
    sel_dst = (node_iota == ids[1:2, :]).astype(jnp.float32)    # (N, E_pad)
    sel = jnp.concatenate([sel_src, sel_dst], axis=1)           # (N, 2*E_pad)

    # Single fused gather matmul: z^T @ sel -> (D, 2*E_pad); split at the
    # 128-lane tile boundary (free static slice).
    zt_sel = lax.dot_general(z, sel,
                             dimension_numbers=(((0,), (0,)), ((), ())),
                             preferred_element_type=jnp.float32)  # (D, 2*E_pad)
    z_src_t = zt_sel[:, :e_pad]                                 # (D, E_pad)
    z_dst_t = zt_sel[:, e_pad:]                                 # (D, E_pad)
    prod_t = z_src_t * z_dst_t                                  # (D, E_pad)

    # Reduce over D on the MXU so the result is lane-dense; write the whole
    # 8-sublane vreg (unmasked vst); the wrapper keeps row 0.
    ones_rows = jnp.ones((8, d), jnp.float32)
    val = jnp.dot(ones_rows, prod_t,
                  preferred_element_type=jnp.float32)           # (8, E_pad)
    rec_a_ref[...] = jax.nn.sigmoid(val).astype(rec_a_ref.dtype)

    # -------- FeatureDecoder: z @ W1 + b1 -> relu -> @ W2 + b2 -> sigmoid ----
    w1 = wpack_ref[0:d, :]                                      # (D, L)
    w2 = wpack_ref[d:d + l, :]                                  # (L, L)
    b1 = wpack_ref[d + l:d + l + 1, :]                          # (1, L)
    b2 = wpack_ref[d + l + 1:d + l + 2, :]                      # (1, L)

    h = jnp.dot(z, w1, preferred_element_type=jnp.float32) + b1
    h = jnp.maximum(h, 0.0)                                     # ReLU
    # TODO(synk): training-mode F.dropout (stateful PRNG mask) not implemented;
    # forward here is eval-mode identity.
    o = jnp.dot(h, w2, preferred_element_type=jnp.float32) + b2
    feats_ref[...] = jax.nn.sigmoid(o).astype(feats_ref.dtype)


# ----------------------------- static (init-time) packing --------------------

def pack_decoder_operands(params, z_dim):
    """Pack lane-padded W1, W2, b1, b2 into one (z_dim + L + 2, L) operand.
    Padded rows/lanes are exactly zero so results stay exact. Done ONCE."""
    h_dim = params["w1"].shape[1]
    out_dim = params["w2"].shape[1]
    l = max(_LANES, pl.cdiv(max(h_dim, out_dim), _LANES) * _LANES)
    w1p = jnp.zeros((z_dim, l), jnp.float32).at[:, :h_dim].set(
        params["w1"].astype(jnp.float32))
    w2p = jnp.zeros((l, l), jnp.float32).at[:h_dim, :out_dim].set(
        params["w2"].astype(jnp.float32))
    b1p = jnp.zeros((1, l), jnp.float32).at[0, :h_dim].set(
        params["b1"].reshape(-1).astype(jnp.float32))
    b2p = jnp.zeros((1, l), jnp.float32).at[0, :out_dim].set(
        params["b2"].reshape(-1).astype(jnp.float32))
    return jnp.concatenate([w1p, w2p, b1p, b2p], axis=0)


def pad_edge_index(edge_index):
    """Pad (2, E) edge index to lane-dense (2, E_pad) int32. Done ONCE per graph."""
    e = edge_index.shape[1]
    e_pad = max(_LANES, pl.cdiv(e, _LANES) * _LANES)
    return jnp.pad(edge_index.astype(jnp.int32), ((0, 0), (0, e_pad - e)))


# ----------------------------- wrapper ----------------------------------------

@functools.partial(jax.jit, static_argnames=("num_edges", "out_dim"))
def full_reconstruction_decoder(z, ei_pad, wpack, *, num_edges, out_dim):
    """Mirrors FullReconstructionDecoder.forward (eval mode, sigmoid=True)."""
    n, d = z.shape
    e_pad = ei_pad.shape[1]
    l = wpack.shape[1]

    # Advisory cost estimate so XLA can overlap this call with neighbors.
    flops = (2 * n * d * (2 * e_pad)        # fused one-hot gather matmul
             + 2 * 8 * d * e_pad            # MXU reduction matmul
             + 2 * n * d * l                # z @ W1 (padded)
             + 2 * n * l * l                # h @ W2 (padded)
             + d * e_pad + 4 * n * l)       # elementwise
    transcendentals = 8 * e_pad + n * l     # sigmoids
    bytes_accessed = 4 * (z.size + wpack.size + 8 * e_pad + n * l) + 4 * ei_pad.size

    rec_a8, feats_pad = pl.pallas_call(
        _fused_decoder_kernel,
        out_shape=(jax.ShapeDtypeStruct((8, e_pad), z.dtype),
                   jax.ShapeDtypeStruct((n, l), z.dtype)),
        in_specs=[_VMEM, _VMEM, _VMEM],
        out_specs=(_VMEM, _VMEM),
        cost_estimate=pl.CostEstimate(flops=flops,
                                      transcendentals=transcendentals,
                                      bytes_accessed=bytes_accessed),
    )(z, ei_pad, wpack)

    # Padded edge lanes / feature lanes are sliced off here (static slices).
    return rec_a8[0, :num_edges], feats_pad[:, :out_dim]


# ----------------------------- param init ------------------------------------

def init_params(dims, key):
    """FeatureDecoder: dims reversed, layers Linear(dims_r[i], dims_r[i+1])
    for i in 1..len(dims)-2. Stored as (in, out) weight + (1, out) bias."""
    dims_r = dims[::-1]
    layer_io = [(dims_r[i], dims_r[i + 1]) for i in range(1, len(dims_r) - 1)]
    params = {}
    for li, (din, dout) in enumerate(layer_io, start=1):
        key, k_w, k_b = jax.random.split(key, 3)
        bound = 1.0 / jnp.sqrt(din)
        params[f"w{li}"] = jax.random.uniform(
            k_w, (din, dout), jnp.float32, minval=-bound, maxval=bound)
        params[f"b{li}"] = jax.random.uniform(
            k_b, (1, dout), jnp.float32, minval=-bound, maxval=bound)
    return params, layer_io


# ----------------------------- reference (pure JAX) ---------------------------

def reference_forward(z, edge_index, params):
    rec_a = jax.nn.sigmoid(jnp.sum(z[edge_index[0]] * z[edge_index[1]], axis=1))
    h = jnp.maximum(z @ params["w1"] + params["b1"], 0.0)
    rec_feats = jax.nn.sigmoid(h @ params["w2"] + params["b2"])
    return rec_a, rec_feats


# ----------------------------- main -------------------------------------------

if __name__ == "__main__":
    # dims as used by the encoder: [feature_dim, hidden1, hidden2, latent].
    # FeatureDecoder builds Linear(32 -> 48) and Linear(48 -> 64), so the input
    # z must have feature dim dims[-2] = 32 (faithful to the module).
    dims = [64, 48, 32, 16]
    num_nodes, num_edges = 16, 8
    z_dim = dims[-2]                                   # 32

    key = jax.random.PRNGKey(0)
    key, k_z, k_e = jax.random.split(key, 3)
    z = jax.random.normal(k_z, (num_nodes, z_dim), jnp.float32)
    edge_index = jax.random.randint(k_e, (2, num_edges), 0, num_nodes,
                                    dtype=jnp.int32)

    params, _ = init_params(dims, key)
    out_dim = params["w2"].shape[1]                    # 64

    # Static packing/padding done once, outside the per-call jitted path.
    wpack = pack_decoder_operands(params, z_dim)       # (32+128+2, 128)
    ei_pad = pad_edge_index(edge_index)                # (2, 128)

    rec_a, rec_feats = full_reconstruction_decoder(
        z, ei_pad, wpack, num_edges=num_edges, out_dim=out_dim)
    jax.block_until_ready((rec_a, rec_feats))

    # correctness check against pure-JAX reference
    ref_a, ref_feats = reference_forward(z, edge_index, params)
    assert rec_a.shape == (num_edges,)
    assert rec_feats.shape == (num_nodes, dims[0])
    assert jnp.allclose(rec_a, ref_a, atol=1e-5, rtol=1e-5)
    assert jnp.allclose(rec_feats, ref_feats, atol=1e-5, rtol=1e-5)

    print("KERNEL_OK")
</pallas_src>

<mosaic_0001>
module attributes {stable_mosaic.version = 11 : i64} {
  func.func @_fused_decoder_kernel(%arg0: memref<16x32xf32, #tpu.memory_space<vmem>>, %arg1: memref<2x128xi32, #tpu.memory_space<vmem>>, %arg2: memref<162x128xf32, #tpu.memory_space<vmem>>, %arg3: memref<8x128xf32, #tpu.memory_space<vmem>>, %arg4: memref<16x128xf32, #tpu.memory_space<vmem>>) attributes {dimension_semantics = [], scalar_prefetch = 0 : i64, scratch_operands = 0 : i64, tpu.core_type = #tpu.core_type<tc>} {
    %c0 = arith.constant 0 : index
    %c0_0 = arith.constant 0 : index
    %0 = vector.load %arg0[%c0, %c0_0] : memref<16x32xf32, #tpu.memory_space<vmem>>, vector<16x32xf32>
    %c0_1 = arith.constant 0 : index
    %c0_2 = arith.constant 0 : index
    %1 = vector.load %arg1[%c0_1, %c0_2] : memref<2x128xi32, #tpu.memory_space<vmem>>, vector<2x128xi32>
    %2 = tpu.iota {dimensions = array<i32: 0>} : vector<16x128xi32>
    %3 = vector.extract_strided_slice %1 {offsets = [0, 0], sizes = [1, 128], strides = [1, 1]} : vector<2x128xi32> to vector<1x128xi32>
    %4 = vector.broadcast %3 : vector<1x128xi32> to vector<16x128xi32>
    %5 = arith.cmpi eq, %2, %4 : vector<16x128xi32>
    %6 = arith.extui %5 : vector<16x128xi1> to vector<16x128xi32>
    %7 = arith.sitofp %6 : vector<16x128xi32> to vector<16x128xf32>
    %8 = vector.extract_strided_slice %1 {offsets = [1, 0], sizes = [1, 128], strides = [1, 1]} : vector<2x128xi32> to vector<1x128xi32>
    %9 = vector.broadcast %8 : vector<1x128xi32> to vector<16x128xi32>
    %10 = arith.cmpi eq, %2, %9 : vector<16x128xi32>
    %11 = arith.extui %10 : vector<16x128xi1> to vector<16x128xi32>
    %12 = arith.sitofp %11 : vector<16x128xi32> to vector<16x128xf32>
    %13 = tpu.concatenate %7, %12 in 1 : vector<16x128xf32>, vector<16x128xf32> -> vector<16x256xf32>
    %cst = arith.constant dense<0.000000e+00> : vector<32x256xf32>
    %14 = tpu.matmul %0, %13, %cst {dimension_numbers = #tpu.dot_dimension_numbers<[0], [0], [1], [1], [0, 1, 1, 1], [], []>} : vector<16x32xf32>, vector<16x256xf32>, vector<32x256xf32> -> vector<32x256xf32>
    %15 = vector.extract_strided_slice %14 {offsets = [0, 0], sizes = [32, 128], strides = [1, 1]} : vector<32x256xf32> to vector<32x128xf32>
    %16 = vector.extract_strided_slice %14 {offsets = [0, 128], sizes = [32, 128], strides = [1, 1]} : vector<32x256xf32> to vector<32x128xf32>
    %17 = arith.mulf %15, %16 : vector<32x128xf32>
    %cst_3 = arith.constant 1.000000e+00 : f32
    %18 = vector.broadcast %cst_3 : f32 to vector<8x32xf32>
    %cst_4 = arith.constant dense<0.000000e+00> : vector<8x128xf32>
    %19 = tpu.matmul %18, %17, %cst_4 {dimension_numbers = #tpu.dot_dimension_numbers<[1], [0], [0], [1], [0, 0, 1, 1], [], []>} : vector<8x32xf32>, vector<32x128xf32>, vector<8x128xf32> -> vector<8x128xf32>
    %20 = arith.negf %19 : vector<8x128xf32>
    %21 = math.exp %20 : vector<8x128xf32>
    %cst_5 = arith.constant 1.000000e+00 : f32
    %22 = vector.broadcast %cst_5 : f32 to vector<8x128xf32>
    %23 = arith.addf %22, %21 : vector<8x128xf32>
    %24 = arith.divf %22, %23 : vector<8x128xf32>
    %c0_6 = arith.constant 0 : index
    %c0_7 = arith.constant 0 : index
    %25 = vector.load %arg3[%c0_6, %c0_7] : memref<8x128xf32, #tpu.memory_space<vmem>>, vector<8x128xf32>
    tpu.vector_store %arg3[%c0_6, %c0_7], %24 {strides = array<i32>} : memref<8x128xf32, #tpu.memory_space<vmem>>, vector<8x128xf32>,
    %c0_8 = arith.constant 0 : index
    %c0_9 = arith.constant 0 : index
    %26 = vector.load %arg2[%c0_8, %c0_9] : memref<162x128xf32, #tpu.memory_space<vmem>>, vector<32x128xf32>
    %c32 = arith.constant 32 : index
    %c0_10 = arith.constant 0 : index
    %27 = vector.load %arg2[%c32, %c0_10] : memref<162x128xf32, #tpu.memory_space<vmem>>, vector<128x128xf32>
    %c160 = arith.constant 160 : index
    %c0_11 = arith.constant 0 : index
    %28 = vector.load %arg2[%c160, %c0_11] : memref<162x128xf32, #tpu.memory_space<vmem>>, vector<1x128xf32>
    %c161 = arith.constant 161 : index
    %c0_12 = arith.constant 0 : index
    %29 = vector.load %arg2[%c161, %c0_12] : memref<162x128xf32, #tpu.memory_space<vmem>>, vector<1x128xf32>
    %cst_13 = arith.constant dense<0.000000e+00> : vector<16x128xf32>
    %30 = tpu.matmul %0, %26, %cst_13 {dimension_numbers = #tpu.dot_dimension_numbers<[1], [0], [0], [1], [0, 0, 1, 1], [], []>} : vector<16x32xf32>, vector<32x128xf32>, vector<16x128xf32> -> vector<16x128xf32>
    %31 = vector.broadcast %28 : vector<1x128xf32> to vector<16x128xf32>
    %32 = arith.addf %30, %31 : vector<16x128xf32>
    %cst_14 = arith.constant 0.000000e+00 : f32
    %33 = vector.broadcast %cst_14 : f32 to vector<16x128xf32>
    %34 = arith.maximumf %32, %33 : vector<16x128xf32>
    %cst_15 = arith.constant dense<0.000000e+00> : vector<16x128xf32>
    %35 = tpu.matmul %34, %27, %cst_15 {dimension_numbers = #tpu.dot_dimension_numbers<[1], [0], [0], [1], [0, 0, 1, 1], [], []>} : vector<16x128xf32>, vector<128x128xf32>, vector<16x128xf32> -> vector<16x128xf32>
    %36 = vector.broadcast %29 : vector<1x128xf32> to vector<16x128xf32>
    %37 = arith.addf %35, %36 : vector<16x128xf32>
    %38 = arith.negf %37 : vector<16x128xf32>
    %39 = math.exp %38 : vector<16x128xf32>
    %cst_16 = arith.constant 1.000000e+00 : f32
    %40 = vector.broadcast %cst_16 : f32 to vector<16x128xf32>
    %41 = arith.addf %40, %39 : vector<16x128xf32>
    %42 = arith.divf %40, %41 : vector<16x128xf32>
    %c0_17 = arith.constant 0 : index
    %c0_18 = arith.constant 0 : index
    %43 = vector.load %arg4[%c0_17, %c0_18] : memref<16x128xf32, #tpu.memory_space<vmem>>, vector<16x128xf32>
    tpu.vector_store %arg4[%c0_17, %c0_18], %42 {strides = array<i32>} : memref<16x128xf32, #tpu.memory_space<vmem>>, vector<16x128xf32>,
    return
  }
}

</mosaic_0001>

<bundles_post_ra>
// kernel: full_reconstruction_decoder.1
= control target key start
LH: loop header
LB: loop body
LE: loop exit
PB: predicated region body
PF: predicated region fallthrough
CT: control target
= control target key end

     0   :  { %10 = vsyncpa [#allocation3], 0  ;;  %s821_s0 = inlined_call_operand.hbm [shape: f32[16,32], index: 0, kind: input, shape index: {}]   ;;  %s822_s1 = inlined_call_operand.hbm [shape: s32[2,128], index: 1, kind: input, shape index: {}]   ;;  %s823_s2 = inlined_call_operand.hbm [shape: f32[162,128], index: 2, kind: input, shape index: {}]   ;;  %s824_s3 = inlined_call_operand.vmem [shape: f32[8,128], index: 3, kind: output, shape index: {0}]   ;;  %s825_s4 = inlined_call_operand.hbm [shape: f32[16,128], index: 4, kind: output, shape index: {1}]  }
   0x1   :  { %11 = vsyncpa [#allocation6], 0 }
   0x2   :  { %12 = vsyncpa [#allocation4], 0  ;;  %s738_s15 = smov [#allocation5]   ;;  %s739_s17 = smov [#allocation2]  }
   0x3   :  { %s31_s16 = sshll.u32 %s738_s15, 4  ;;  %s18_s18 = sshll.u32 %s739_s17, 4  ;;  %s32_s16 = int_to_ptr.vmem [resolvable:$true] %s31_s16  ;;  %s19_s18 = int_to_ptr.vmem [resolvable:$true] %s18_s18 }
   0x4   :  { %s660_s19 = scalar_lea.vmem %s32_s16, 32  ;;  %p665_p1 = scmp.lt.s32.totalorder %s32_s16, %s32_s16 }
   0x5   :  { %p661_p0 = scmp.ne.s32.totalorder %s32_s16, %s660_s19  ;;  %p666_p2 = scmp.lt.s32.totalorder %s660_s19, %s660_s19 }
   0x7   :  { %p667_p3 = por %p666_p2, %p665_p1 }
   0x9   :  { %p668_p4 = pnand %p667_p3, %p661_p0 }
   0xb   :  { %671 = shalt.err (!%p668_p4)
}
   0xc   :  { %34 = dma.hbm_to_vmem [thread:$0]  %s822_s1, 32, %s32_s16, [#allocation6]  }
   0xd   :  { %s680_s22 = scalar_lea.vmem %s19_s18, 256  ;;  %p685_p6 = scmp.lt.s32.totalorder %s19_s18, %s19_s18 }
   0xe   :  { %p681_p5 = scmp.ne.s32.totalorder %s19_s18, %s680_s22  ;;  %p686_p7 = scmp.lt.s32.totalorder %s680_s22, %s680_s22 }
  0x10   :  { %p687_p8 = por %p686_p7, %p685_p6 }
  0x12   :  { %p688_p9 = pnand %p687_p8, %p681_p5 }
  0x14   :  { %691 = shalt.err (!%p688_p9)
}
  0x15   :  { %s740_s23 = smov 128   ;;  %s741_s24 = smov 8  }
  0x16   :  { %24 = dma.hbm_to_vmem [thread:$0]  %s821_s0, 256, %s19_s18, [#allocation3], %s740_s23, %s740_s23, %s741_s24  }
  0x17   :  { %s742_s27 = smov [#allocation7]  }
  0x18   :  { %s40_s28 = sshll.u32 %s742_s27, 4  ;;  %s41_s28 = int_to_ptr.vmem [resolvable:$true] %s40_s28 }
  0x19   :  { %s700_s1 = scalar_lea.vmem %s41_s28, 2688  ;;  %p705_p11 = scmp.lt.s32.totalorder %s41_s28, %s41_s28 }
  0x1a   :  { %p701_p10 = scmp.ne.s32.totalorder %s41_s28, %s700_s1  ;;  %p706_p12 = scmp.lt.s32.totalorder %s700_s1, %s700_s1 }
  0x1c   :  { %p707_p13 = por %p706_p12, %p705_p11 }
  0x1e   :  { %p708_p0 = pnand %p707_p13, %p701_p10 }
  0x20   :  { %711 = shalt.err (!%p708_p0)
}
  0x21   :  { %46 = dma.hbm_to_vmem [thread:$0]  %s823_s2, 2688, %s41_s28, [#allocation6], %s740_s23, %s740_s23, %s741_s24  }
  0x22   :  { %732 = dma.done.wait [#allocation3], 256  }
  0x23   :  { %733 = vsyncadd [#allocation3], 4294967040 }
  0x24   :  { %734 = dma.done.wait [#allocation6], 2720  }
  0x25   :  { %735 = vsyncadd [#allocation6], 4294964576  ;;  %v59_v0 = vlaneseq  ;;  %v743_v1 = vmov 0.0   ;;  %v788_v6 = vld [vmem:[#allocation2] sm:$0xff]  ;;  %v58_v7 = vld [vmem:[#allocation5] sm:$0x3] }
  0x26   :  { %191 = vmatprep.mubr.f32.mxu1 %v743_v1  ;;  %82 = vxpose.xlu0.b32.start [1/2] (short) (narrow) %v788_v6, 32  ;;  %v791_v10 = vld [vmem:[#allocation2 + $0x8] sm:$0xff]  ;;  %v744_v11 = vmov 1.0   ;;  %vm114_vm4 = vcmask 130048   ;;  %vm745_vm5 = vmmov 0   ;;  %v318_v18 = vld [vmem:[#allocation7 + $0x88] sm:$0xff] }
  0x27   :  { %v60_v2 = vshrl.u32 %v59_v0, 7  ;;  %v320_v16 = vld [vmem:[#allocation7 + $0x98] sm:$0xff]  ;;  %v319_v17 = vld [vmem:[#allocation7 + $0x90] sm:$0xff]  ;;  %v317_v19 = vld [vmem:[#allocation7 + $0x80] sm:$0xff]  ;;  %vm220_vm6 = vcmask 261120   ;;  %s746_s5 = smov [#allocation8]  }
  0x28   :  { %596 = vmatprep.subr.mxu0 %v320_v16  ;;  %v316_v20 = vld [vmem:[#allocation7 + $0x78] sm:$0xff]  ;;  %v315_v21 = vld [vmem:[#allocation7 + $0x70] sm:$0xff]  ;;  %v314_v22 = vld [vmem:[#allocation7 + $0x68] sm:$0xff]  ;;  %s510_s6 = sshll.u32 %s746_s5, 4  ;;  %s511_s6 = int_to_ptr.vmem [resolvable:$true] %s510_s6 }
  0x29   :  { %v74_v3 = vsub.s32 1, %v60_v2  ;;  %v64_v4 = vsub.s32 0, %v60_v2  ;;  %v61_v5 = vadd.s32 8, %v60_v2  ;;  %597 = vmatpush3.msra.mxu0 %v320_v16  ;;  %v313_v23 = vld [vmem:[#allocation7 + $0x60] sm:$0xff]  ;;  %v312_v24 = vld [vmem:[#allocation7 + $0x58] sm:$0xff]  ;;  %v311_v25 = vld [vmem:[#allocation7 + $0x50] sm:$0xff]  ;;  %p717_p2 = scmp.lt.s32.totalorder %s511_s6, %s511_s6 }
  0x2a   :  { %83 = vxpose.xlu0.b32.end [2/2] (short) (narrow) %v791_v10, 32  ;;  %598 = vmatprep.subr.mxu0 %v319_v17  ;;  %v304_v38 = vld [vmem:[#allocation7 + $0x18] sm:$0xff]  ;;  %v303_v39 = vld [vmem:[#allocation7 + $0x10] sm:$0xff]  ;;  %v302_v40 = vld [vmem:[#allocation7 + $0x8] sm:$0xff] }
  0x2b   :  { %v75_v8 = vrot.slane %v58_v7, %v74_v3  ;;  %v65_v9 = vrot.slane %v58_v7, %v64_v4  ;;  %599 = vmatpush3.msra.mxu0 %v319_v17  ;;  %v301_v41 = vld [vmem:[#allocation7] sm:$0xff]  ;;  %v310_v42 = vld [vmem:[#allocation7 + $0x48] sm:$0xff]  ;;  %v308_v44 = vld [vmem:[#allocation7 + $0x38] sm:$0xff] }
  0x2c   :  { %600 = vmatprep.subr.mxu0 %v318_v18  ;;  %v309_v43 = vld [vmem:[#allocation7 + $0x40] sm:$0xff]  ;;  %v307_v45 = vld [vmem:[#allocation7 + $0x30] sm:$0xff]  ;;  %v306_v46 = vld [vmem:[#allocation7 + $0x28] sm:$0xff] }
  0x2d   :  { %vm77_vm0 = vcmp.eq.s32.totalorder %v61_v5, %v75_v8  ;;  %vm67_vm1 = vcmp.eq.s32.totalorder %v61_v5, %v65_v9  ;;  %vm76_vm2 = vcmp.eq.s32.totalorder %v60_v2, %v75_v8  ;;  %vm66_vm3 = vcmp.eq.s32.totalorder %v60_v2, %v65_v9  ;;  %601 = vmatpush3.msra.mxu0 %v318_v18  ;;  %v305_v47 = vld [vmem:[#allocation7 + $0x20] sm:$0xff] }
  0x2e   :  { %529 = vmatprep.subr.msk.mxu1 %vm77_vm0, %v744_v11  ;;  %602 = vmatprep.subr.mxu0 %v317_v19  ;;  %v539_v51 = vld [vmem:[#allocation7 + $0xa0] ss:$0 sm:$0xff]  ;;  %v542_v61 = vld [vmem:[#allocation7 + $0xa1] ss:$0 sm:$0xff] }
  0x2f   :  { %530 = vmatpush1.msk.msra.mxu1 %vm67_vm1, %v744_v11  ;;  %603 = vmatpush3.msra.mxu0 %v317_v19 }
  0x30   :  { %531 = vmatprep.subr.msk.mxu1 %vm76_vm2, %v744_v11  ;;  %604 = vmatprep.subr.mxu0 %v316_v20 }
  0x31   :  { %532 = vmatpush1.msk.msra.mxu1 %vm66_vm3, %v744_v11  ;;  %605 = vmatpush3.msra.mxu0 %v316_v20 }
  0x32   :  { %574 = vmatprep.subr.mxu1 %v743_v1  ;;  %606 = vmatprep.subr.mxu0 %v315_v21 }
  0x33   :  { %607 = vmatpush3.msra.mxu0 %v315_v21 }
  0x34   :  { %608 = vmatprep.subr.mxu0 %v314_v22 }
  0x35   :  { %609 = vmatpush3.msra.mxu0 %v314_v22 }
  0x36   :  { %610 = vmatprep.subr.mxu0 %v313_v23 }
  0x37   :  { %611 = vmatpush3.msra.mxu0 %v313_v23 }
  0x38   :  { %612 = vmatprep.subr.mxu0 %v312_v24 }
  0x39   :  { %613 = vmatpush3.msra.mxu0 %v312_v24 }
  0x3a   :  { %614 = vmatprep.subr.mxu0 %v311_v25 }
  0x3b   :  { %615 = vmatpush3.msra.mxu0 %v311_v25 }
  0x3c   :  { %616 = vmatprep.subr.mxu0 %v310_v42 }
  0x3d   :  { %617 = vmatpush3.msra.mxu0 %v310_v42 }
  0x3e   :  { %618 = vmatprep.subr.mxu0 %v309_v43 }
  0x3f   :  { %619 = vmatpush3.msra.mxu0 %v309_v43 }
  0x40   :  { %620 = vmatprep.subr.mxu0 %v308_v44 }
  0x41   :  { %621 = vmatpush3.msra.mxu0 %v308_v44 }
  0x42   :  { %622 = vmatprep.subr.mxu0 %v307_v45 }
  0x43   :  { %623 = vmatpush3.msra.mxu0 %v307_v45 }
  0x44   :  { %624 = vmatprep.subr.mxu0 %v306_v46 }
  0x45   :  { %625 = vmatpush3.msra.mxu0 %v306_v46 }
  0x46   :  { %626 = vmatprep.subr.mxu0 %v305_v47 }
  0x47   :  { %627 = vmatpush3.msra.mxu0 %v305_v47 }
  0xa2   :  { %v98_v12 = vpop.trf.xlu0 }
  0xa3   :  { %533 = vmatmul.mubr.msk.f32.vlgmr.msra.gmra.mxu1 %vm114_vm4, %v98_v12 }
  0xa4   :  { %197 = vmatprep.mubr.f32.mxu1 %v743_v1 }
  0xa6   :  { %v99_v13 = vpop.trf.xlu0 }
  0xa7   :  { %534 = vmatmul.mubr.msk.f32.gmra.mxu1 %vm114_vm4, %v99_v13 }
  0xa8   :  { %203 = vmatprep.mubr.f32.mxu1 %v743_v1 }
  0xaa   :  { %v100_v14 = vpop.trf.xlu0 }
  0xab   :  { %535 = vmatmul.mubr.msk.f32.gmra.mxu1 %vm114_vm4, %v100_v14 }
  0xac   :  { %209 = vmatprep.mubr.f32.mxu1 %v743_v1 }
  0xae   :  { %v101_v15 = vpop.trf.xlu0 }
  0xaf   :  { %536 = vmatmul.mubr.msk.f32.gmra.mxu1 %vm114_vm4, %v101_v15 }
  0xb0   :  { %582 = vmatprep.mubr.msk.f32.mxu1 %vm745_vm5, %v743_v1 }
 0x163   :  { %v193_v26 = vpop.f32.mrf.mxu1 }
 0x165   :  { %v195_v27 = vpop.f32.mrf.mxu1 }
 0x166   :  { %v216_v37 = vmul.f32 %v195_v27, %v193_v26 }
 0x167   :  { %v199_v28 = vpop.f32.mrf.mxu1 }
 0x169   :  { %v201_v29 = vpop.f32.mrf.mxu1 }
 0x16a   :  { %v217_v36 = vmul.f32 %v201_v29, %v199_v28 }
 0x16b   :  { %v205_v30 = vpop.f32.mrf.mxu1 }
 0x16d   :  { %v207_v31 = vpop.f32.mrf.mxu1 }
 0x16e   :  { %v218_v35 = vmul.f32 %v207_v31, %v205_v30 }
 0x16f   :  { %v211_v32 = vpop.f32.mrf.mxu1 }
 0x171   :  { %v213_v33 = vpop.f32.mrf.mxu1 }
 0x172   :  { %v219_v34 = vmul.f32 %v213_v33, %v211_v32 }
 0x174   :  { %575 = vmatpush3.msra.mxu1 %v219_v34 }
 0x175   :  { %576 = vmatprep.subr.mxu1 %v743_v1 }
 0x176   :  { %577 = vmatpush3.msra.mxu1 %v218_v35 }
 0x177   :  { %578 = vmatprep.subr.mxu1 %v743_v1 }
 0x178   :  { %579 = vmatpush3.msra.mxu1 %v217_v36 }
 0x179   :  { %580 = vmatprep.subr.mxu1 %v743_v1 }
 0x17a   :  { %581 = vmatpush3.msra.mxu1 %v216_v37 }
 0x17b   :  { %585 = vmatprep.subr.mxu1 %v304_v38  ;;  %583 = vmatmul.mubr.msk.f32.vlgmr.msra.gmra.mxu1 %vm220_vm6, %v744_v11 }
 0x17c   :  { %586 = vmatpush3.msra.mxu1 %v304_v38  ;;  %593 = vmatprep.mubr.msk.f32.mxu1 %vm220_vm6, %v788_v6 }
 0x17d   :  { %587 = vmatprep.subr.mxu1 %v303_v39 }
 0x17e   :  { %588 = vmatpush3.msra.mxu1 %v303_v39 }
 0x17f   :  { %589 = vmatprep.subr.mxu1 %v302_v40 }
 0x180   :  { %590 = vmatpush3.msra.mxu1 %v302_v40 }
 0x181   :  { %591 = vmatprep.subr.mxu1 %v301_v41 }
 0x182   :  { %592 = vmatpush3.msra.mxu1 %v301_v41 }
 0x183   :  { %594 = vmatmul.mubr.msk.f32.vlgmr.msra.gmra.mxu1 %vm220_vm6, %v791_v10 }
 0x23b   :  { %v290_v48 = vpop.f32.mrf.mxu1 }
 0x23c   :  { %v538_v49 = vmul.f32 -1.442695, %v290_v48 }
 0x23d   :  { %v584_v50 = vpop.f32.mrf.mxu1 }
 0x23e   :  { %640 = vpow2.f32 %v538_v49 }
 0x243   :  { %v595_v52 = vpop.f32.mrf.mxu1 }
 0x244   :  { %v405_v53 = vadd.f32 %v595_v52, %v539_v51 }
 0x245   :  { %v399_v54 = vpop.f32.mrf.mxu1 }
 0x246   :  { %v400_v55 = vadd.f32 %v539_v51, %v399_v54  ;;  %v409_v57 = vmax.f32 %v405_v53, 0.0 }
 0x248   :  { %v408_v56 = vmax.f32 %v400_v55, 0.0 }
 0x24a   :  { %628 = vmatprep.mubr.f32.mxu0 %v408_v56 }
 0x24b   :  { %v641_v58 = vpop.eup %640  ;;  %629 = vmatmul.mubr.f32.vlgmr.msra.gmra.mxu0 %v409_v57 }
 0x24c   :  { %v297_v59 = vadd.f32 1.0, %v641_v58 }
 0x24e   :  { %642 = vrcp.f32 %v297_v59 }
 0x25b   :  { %v643_v60 = vpop.eup %642 }
 0x25c   :  { %300 = vst [vmem:[%s824_s3] sm:$0xff] %v643_v60  ;;  %s712_s3 = scalar_lea.vmem %s511_s6, 256 }
 0x25d   :  { %p713_p1 = scmp.ne.s32.totalorder %s511_s6, %s712_s3  ;;  %p718_p3 = scmp.lt.s32.totalorder %s712_s3, %s712_s3 }
 0x25f   :  { %p719_p4 = por %p718_p3, %p717_p2 }
 0x261   :  { %p720_p5 = pnand %p719_p4, %p713_p1 }
 0x30b   :  { %v630_v62 = vpop.f32.mrf.mxu0 }
 0x30c   :  { %v486_v63 = vadd.f32 %v630_v62, %v542_v61 }
 0x30d   :  { %v480_v0 = vpop.f32.mrf.mxu0 }
 0x30e   :  { %v544_v1 = vmul.f32 -1.442695, %v486_v63  ;;  %v481_v2 = vadd.f32 %v542_v61, %v480_v0 }
 0x310   :  { %644 = vpow2.f32 %v544_v1  ;;  %v543_v3 = vmul.f32 -1.442695, %v481_v2 }
 0x312   :  { %646 = vpow2.f32 %v543_v3 }
 0x31d   :  { %v645_v4 = vpop.eup %644 }
 0x31e   :  { %v496_v5 = vadd.f32 1.0, %v645_v4 }
 0x31f   :  { %v647_v6 = vpop.eup %646 }
 0x320   :  { %648 = vrcp.f32 %v496_v5  ;;  %v495_v7 = vadd.f32 1.0, %v647_v6 }
 0x322   :  { %650 = vrcp.f32 %v495_v7 }
 0x32d   :  { %v649_v8 = vpop.eup %648 }
 0x32e   :  { %502 = vst [vmem:[#allocation8 + $0x8] sm:$0xff] %v649_v8 }
 0x32f   :  { %v651_v9 = vpop.eup %650 }
 0x330   :  { %501 = vst [vmem:[#allocation8] sm:$0xff] %v651_v9 }
 0x331   :  { %723 = shalt.err (!%p720_p5)
}
 0x332   :  { %516 = dma.vmem_to_hbm [thread:$0]  %s511_s6, 256, %s825_s4, [#allocation4], %s740_s23, %s740_s23, %s741_s24  }
 0x333   :  { %736 = dma.done.wait [#allocation4], 256  }
 0x334   :  { %737 = vsyncadd [#allocation4], 4294967040 }
 0x335   :  { %522 = vsyncpa [#allocation3], 1 }
 0x336   :  { %523 = vsyncpa [#allocation6], 1 }
 0x337   :  { %524 = vsyncpa [#allocation4], 1 }

</bundles_post_ra>
